<compile_context>
chip_gen: v7x
topology: tpu7x:2x2x1
jax: 0.10.0
libtpu: 0.0.40
codegen_flags: <defaults>
</compile_context>

<pallas_src>
import functools

import jax
import jax.numpy as jnp
from jax.experimental import pallas as pl
from jax.experimental.pallas import tpu as pltpu


def _round_up(x: int, m: int) -> int:
    return ((x + m - 1) // m) * m


def _graph_conv_kernel(*refs, project_first: bool, apply_relu: bool):
    # Argument layout depends (statically) on the branch: the project-first path does
    # not need W inside the kernel at all (projection is pre-folded into the messages).
    if project_first:
        adj_ref, msg_ref, bias_ref, dst_norm_ref, out_ref, acc_ref = refs
        w_ref = None
    else:
        adj_ref, msg_ref, w_ref, bias_ref, dst_norm_ref, out_ref, acc_ref = refs

    k = pl.program_id(1)

    @pl.when(k == 0)
    def _init():
        acc_ref[...] = jnp.zeros_like(acc_ref)

    # bf16 x bf16 -> f32 accumulate: single-pass MXU, no in-kernel upcast/convert.
    acc_ref[...] += jnp.dot(adj_ref[...], msg_ref[...],
                            preferred_element_type=jnp.float32)

    @pl.when(k == pl.num_programs(1) - 1)
    def _finalize():
        rst = acc_ref[...]
        if not project_first:
            # aggregate-then-project: small per-dst-tile matmul, bf16 operands,
            # f32 accumulation.
            rst = jnp.dot(rst.astype(w_ref.dtype), w_ref[...],
                          preferred_element_type=jnp.float32)
        rst = rst * dst_norm_ref[...] + bias_ref[...]
        if apply_relu:
            rst = jnp.maximum(rst, 0.0)
        out_ref[...] = rst.astype(out_ref.dtype)


def graph_conv(adj, feat, weight, bias, *, activation=None,
               tm=256, tk=1024, adj_compute_dtype=jnp.bfloat16, out_dtype=None):
    """Pallas GraphConv forward.

    adj:    (N, N)    dense adjacency, adj[dst, src] = 1 iff edge src->dst
    feat:   (N, Fin)  node features
    weight: (Fin, Fout)
    bias:   (Fout,)
    activation: None or "relu"
    """
    n, in_feats = feat.shape
    out_feats = weight.shape[1]
    assert adj.shape == (n, n)
    assert weight.shape[0] == in_feats
    assert bias.shape == (out_feats,)
    # TODO(synk): arbitrary activation callables are not fused; only None / "relu".
    assert activation in (None, "relu")
    assert tm % 8 == 0 and tk % 128 == 0

    project_first = in_feats > out_feats
    f32 = jnp.float32
    bf16 = jnp.bfloat16
    out_dtype = feat.dtype if out_dtype is None else out_dtype

    # --- one bf16 pass over the N^2 adjacency; degrees reduced from that copy
    # (0/1 is exact in bf16, accumulation in f32, so degrees are exact integers).
    adj_b = adj.astype(adj_compute_dtype)
    deg = jnp.sum(adj_b, axis=1, dtype=f32, keepdims=True)          # (n, 1)
    norm = jax.lax.rsqrt(jnp.maximum(deg, 1.0))                     # clamp(1)**-0.5

    # --- fold the src-side norm (and, in the project-first branch, the W projection)
    # into the streamed message array ONCE, outside the grid loop.
    msg = feat.astype(f32) * norm                                   # (n, Fin)
    if project_first:
        msg = jnp.dot(msg, weight.astype(f32),
                      precision=jax.lax.Precision.HIGHEST)          # (n, Fout)

    # --- tile / padding geometry (lane-dense features, (8,128)-friendly A tiles).
    tm = min(tm, _round_up(n, 8))
    tk = min(tk, _round_up(n, 128))
    n_dst = _round_up(n, tm)
    n_src = _round_up(n, tk)
    fin_p = _round_up(in_feats, 128)
    fout_p = _round_up(out_feats, 128)
    fmsg_p = fout_p if project_first else fin_p                     # streamed msg width

    adj_p = jnp.pad(adj_b, ((0, n_dst - n), (0, n_src - n)))
    msg_p = jnp.pad(msg, ((0, n_src - n), (0, fmsg_p - msg.shape[1]))).astype(bf16)
    b_p = jnp.pad(bias.astype(f32), (0, fout_p - out_feats)).reshape(1, fout_p)
    norm_dst = jnp.pad(norm, ((0, n_dst - n), (0, 0)))

    grid = (n_dst // tm, n_src // tk)

    in_specs = [
        pl.BlockSpec((tm, tk), lambda i, k: (i, k)),          # A tile (bf16)
        pl.BlockSpec((tk, fmsg_p), lambda i, k: (k, 0)),      # message tile (bf16)
    ]
    args = [adj_p, msg_p]
    if not project_first:
        w_p = jnp.pad(weight.astype(f32),
                      ((0, fin_p - in_feats), (0, fout_p - out_feats))).astype(bf16)
        in_specs.append(pl.BlockSpec((fin_p, fout_p), lambda i, k: (0, 0)))  # W (whole)
        args.append(w_p)
    in_specs += [
        pl.BlockSpec((1, fout_p), lambda i, k: (0, 0)),       # bias
        pl.BlockSpec((tm, 1), lambda i, k: (i, 0)),           # dst-side norm
    ]
    args += [b_p, norm_dst]

    kernel = functools.partial(
        _graph_conv_kernel,
        project_first=project_first,
        apply_relu=(activation == "relu"),
    )

    proj_flops = 0 if project_first else 2 * n_dst * fin_p * fout_p
    bytes_accessed = (adj_p.size * adj_p.dtype.itemsize
                      + msg_p.size * 2
                      + (0 if project_first else fin_p * fout_p * 2)
                      + n_dst * fout_p * jnp.dtype(out_dtype).itemsize)
    cost = pl.CostEstimate(
        flops=int(2 * n_dst * n_src * fmsg_p + proj_flops),
        transcendentals=0,
        bytes_accessed=int(bytes_accessed),
    )

    out_padded = pl.pallas_call(
        kernel,
        out_shape=jax.ShapeDtypeStruct((n_dst, fout_p), out_dtype),
        grid_spec=pltpu.PrefetchScalarGridSpec(
            num_scalar_prefetch=0,
            grid=grid,
            in_specs=in_specs,
            out_specs=pl.BlockSpec((tm, fout_p), lambda i, k: (i, 0)),
            scratch_shapes=[pltpu.VMEM((tm, fmsg_p), jnp.float32)],
        ),
        compiler_params=pltpu.CompilerParams(
            dimension_semantics=("parallel", "arbitrary")),
        cost_estimate=cost,
    )(*args)

    return out_padded[:n, :out_feats]


def graph_conv_ref(adj, feat, weight, bias, *, activation=None):
    """Pure-JAX f32 reference mirroring the PyTorch/DGL module."""
    hi = jax.lax.Precision.HIGHEST
    deg = jnp.sum(adj, axis=1, keepdims=True)
    norm = jnp.power(jnp.maximum(deg, 1.0), -0.5)    # clamp(min=1) ** -0.5
    feat = feat * norm
    if feat.shape[1] > weight.shape[1]:
        rst = jnp.dot(adj, jnp.dot(feat, weight, precision=hi), precision=hi)
    else:
        rst = jnp.dot(jnp.dot(adj, feat, precision=hi), weight, precision=hi)
    rst = rst * norm + bias.reshape(1, -1)
    if activation == "relu":
        rst = jnp.maximum(rst, 0.0)
    return rst


def _rel_err(a, b):
    num = jnp.linalg.norm((a - b).astype(jnp.float32))
    den = jnp.maximum(jnp.linalg.norm(b.astype(jnp.float32)), 1.0)
    return float(num / den)


if __name__ == "__main__":
    key = jax.random.PRNGKey(0)
    k_adj, k_f1, k_w1, k_b1, k_f2, k_w2, k_b2 = jax.random.split(key, 7)

    N = 32  # nodes

    # deterministic random graph (dense 0/1 adjacency, adj[dst, src])
    adj = (jax.random.uniform(k_adj, (N, N)) < 0.25).astype(jnp.float32)

    def make_params(kf, kw, kb, fin, fout):
        feat = jax.random.normal(kf, (N, fin), dtype=jnp.float32)
        s = (6.0 / (fin + fout)) ** 0.5  # xavier-uniform-like scale
        w = jax.random.uniform(kw, (fin, fout), minval=-s, maxval=s, dtype=jnp.float32)
        b = jax.random.uniform(kb, (fout,), minval=-0.1, maxval=0.1, dtype=jnp.float32)
        return feat, w, b

    # Branch 1: in_feats > out_feats  ->  project-then-aggregate, no activation.
    feat1, w1, b1 = make_params(k_f1, k_w1, k_b1, 16, 8)
    out1 = jax.block_until_ready(graph_conv(adj, feat1, w1, b1, activation=None))
    ref1 = graph_conv_ref(adj, feat1, w1, b1, activation=None)
    assert out1.shape == (N, 8)
    # bf16 message operands -> loosened tolerance vs the f32 reference.
    assert _rel_err(out1, ref1) < 2e-2, "branch-1 mismatch vs reference"

    # Branch 2: in_feats <= out_feats ->  aggregate-then-project, relu activation.
    feat2, w2, b2 = make_params(k_f2, k_w2, k_b2, 8, 16)
    out2 = jax.block_until_ready(graph_conv(adj, feat2, w2, b2, activation="relu"))
    ref2 = graph_conv_ref(adj, feat2, w2, b2, activation="relu")
    assert out2.shape == (N, 16)
    assert _rel_err(out2, ref2) < 2e-2, "branch-2 mismatch vs reference"

    print("KERNEL_OK")
</pallas_src>

<mosaic_0001>
module attributes {stable_mosaic.version = 11 : i64} {
  func.func @_graph_conv_kernel(%arg0: i32, %arg1: i32, %arg2: memref<32x128xbf16, #tpu.memory_space<vmem>>, %arg3: memref<128x128xbf16, #tpu.memory_space<vmem>>, %arg4: memref<1x128xf32, #tpu.memory_space<vmem>>, %arg5: memref<32x1xf32, #tpu.memory_space<vmem>>, %arg6: memref<32x128xf32, #tpu.memory_space<vmem>>, %arg7: memref<32x128xf32, #tpu.memory_space<vmem>>) attributes {dimension_semantics = [#tpu.dimension_semantics<parallel>, #tpu.dimension_semantics<arbitrary>], iteration_bounds = array<i64: 1, 1>, scalar_prefetch = 0 : i64, scratch_operands = 1 : i64, tpu.core_type = #tpu.core_type<tc>, window_params = [{transform_indices = @transform_0, window_bounds = array<i64: 32, 128>}, {transform_indices = @transform_1, window_bounds = array<i64: 128, 128>}, {pipeline_mode = #tpu.pipeline_mode<synchronous>, transform_indices = @transform_2, window_bounds = array<i64: 1, 128>}, {transform_indices = @transform_3, window_bounds = array<i64: 32, 1>}, {transform_indices = @transform_4, window_bounds = array<i64: 32, 128>}]} {
    %c0_i32 = arith.constant 0 : i32
    %0 = arith.cmpi eq, %arg1, %c0_i32 : i32
    %1 = arith.extui %0 : i1 to i32
    %c0_i32_0 = arith.constant 0 : i32
    %2 = arith.cmpi ne, %1, %c0_i32_0 : i32
    scf.if %2 {
      %cst_10 = arith.constant 0.000000e+00 : f32
      %12 = vector.broadcast %cst_10 : f32 to vector<32x128xf32>
      %c0_11 = arith.constant 0 : index
      %c0_12 = arith.constant 0 : index
      %13 = vector.load %arg7[%c0_11, %c0_12] : memref<32x128xf32, #tpu.memory_space<vmem>>, vector<32x128xf32>
      tpu.vector_store %arg7[%c0_11, %c0_12], %12 {strides = array<i32>} : memref<32x128xf32, #tpu.memory_space<vmem>>, vector<32x128xf32>,
    } else {
    }
    %c0 = arith.constant 0 : index
    %c0_1 = arith.constant 0 : index
    %3 = vector.load %arg7[%c0, %c0_1] : memref<32x128xf32, #tpu.memory_space<vmem>>, vector<32x128xf32>
    %c0_2 = arith.constant 0 : index
    %c0_3 = arith.constant 0 : index
    %4 = vector.load %arg2[%c0_2, %c0_3] : memref<32x128xbf16, #tpu.memory_space<vmem>>, vector<32x128xbf16>
    %c0_4 = arith.constant 0 : index
    %c0_5 = arith.constant 0 : index
    %5 = vector.load %arg3[%c0_4, %c0_5] : memref<128x128xbf16, #tpu.memory_space<vmem>>, vector<128x128xbf16>
    %cst = arith.constant dense<0.000000e+00> : vector<32x128xf32>
    %6 = tpu.matmul %4, %5, %cst {dimension_numbers = #tpu.dot_dimension_numbers<[1], [0], [0], [1], [0, 0, 1, 1], [], []>} : vector<32x128xbf16>, vector<128x128xbf16>, vector<32x128xf32> -> vector<32x128xf32>
    %7 = arith.addf %3, %6 : vector<32x128xf32>
    %c0_6 = arith.constant 0 : index
    %c0_7 = arith.constant 0 : index
    %8 = vector.load %arg7[%c0_6, %c0_7] : memref<32x128xf32, #tpu.memory_space<vmem>>, vector<32x128xf32>
    tpu.vector_store %arg7[%c0_6, %c0_7], %7 {strides = array<i32>} : memref<32x128xf32, #tpu.memory_space<vmem>>, vector<32x128xf32>,
    %c0_i32_8 = arith.constant 0 : i32
    %9 = arith.cmpi eq, %arg1, %c0_i32_8 : i32
    %10 = arith.extui %9 : i1 to i32
    %c0_i32_9 = arith.constant 0 : i32
    %11 = arith.cmpi ne, %10, %c0_i32_9 : i32
    scf.if %11 {
      %c0_10 = arith.constant 0 : index
      %c0_11 = arith.constant 0 : index
      %12 = vector.load %arg7[%c0_10, %c0_11] : memref<32x128xf32, #tpu.memory_space<vmem>>, vector<32x128xf32>
      %c0_12 = arith.constant 0 : index
      %c0_13 = arith.constant 0 : index
      %13 = vector.load %arg5[%c0_12, %c0_13] : memref<32x1xf32, #tpu.memory_space<vmem>>, vector<32x1xf32>
      %14 = vector.broadcast %13 : vector<32x1xf32> to vector<32x128xf32>
      %15 = arith.mulf %12, %14 : vector<32x128xf32>
      %c0_14 = arith.constant 0 : index
      %c0_15 = arith.constant 0 : index
      %16 = vector.load %arg4[%c0_14, %c0_15] : memref<1x128xf32, #tpu.memory_space<vmem>>, vector<1x128xf32>
      %17 = vector.broadcast %16 : vector<1x128xf32> to vector<32x128xf32>
      %18 = arith.addf %15, %17 : vector<32x128xf32>
      %c0_16 = arith.constant 0 : index
      %c0_17 = arith.constant 0 : index
      %19 = vector.load %arg6[%c0_16, %c0_17] : memref<32x128xf32, #tpu.memory_space<vmem>>, vector<32x128xf32>
      tpu.vector_store %arg6[%c0_16, %c0_17], %18 {strides = array<i32>} : memref<32x128xf32, #tpu.memory_space<vmem>>, vector<32x128xf32>,
    } else {
    }
    return
  }
  func.func @transform_0(%arg0: i32, %arg1: i32) -> (i32, i32) {
    %c0_i32 = arith.constant 0 : i32
    return %arg0, %arg1 : i32, i32
  }
  func.func @transform_1(%arg0: i32, %arg1: i32) -> (i32, i32) {
    %c0_i32 = arith.constant 0 : i32
    %c0_i32_0 = arith.constant 0 : i32
    return %arg1, %c0_i32 : i32, i32
  }
  func.func @transform_2(%arg0: i32, %arg1: i32) -> (i32, i32) {
    %c0_i32 = arith.constant 0 : i32
    %c0_i32_0 = arith.constant 0 : i32
    %c0_i32_1 = arith.constant 0 : i32
    return %c0_i32, %c0_i32_0 : i32, i32
  }
  func.func @transform_3(%arg0: i32, %arg1: i32) -> (i32, i32) {
    %c0_i32 = arith.constant 0 : i32
    %c0_i32_0 = arith.constant 0 : i32
    return %arg0, %c0_i32 : i32, i32
  }
  func.func @transform_4(%arg0: i32, %arg1: i32) -> (i32, i32) {
    %c0_i32 = arith.constant 0 : i32
    %c0_i32_0 = arith.constant 0 : i32
    return %arg0, %c0_i32 : i32, i32
  }
}

</mosaic_0001>

<bundles_post_ra>
// kernel: tpu_custom_call.1
= control target key start
LH: loop header
LB: loop body
LE: loop exit
PB: predicated region body
PF: predicated region fallthrough
CT: control target
= control target key end

     0   :  { %9 = vsyncpa [#allocation4], 0  ;;  %s434_s0 = inlined_call_operand.vmem [shape: bf16[32,128], index: 0, kind: input, shape index: {}]   ;;  %s435_s1 = inlined_call_operand.hbm [shape: bf16[128,128], index: 1, kind: input, shape index: {}]   ;;  %s436_s2 = inlined_call_operand.vmem [shape: f32[1,128], index: 2, kind: input, shape index: {}]   ;;  %s437_s3 = inlined_call_operand.vmem [shape: f32[32,1], index: 3, kind: input, shape index: {}]   ;;  %s438_s4 = inlined_call_operand.hbm [shape: f32[32,128], index: 4, kind: output, shape index: {}]  }
   0x1   :  { %10 = vsyncpa [#allocation5], 0  ;;  %s357_s15 = smov [#allocation3]   ;;  %s309_s19 = scalar_lea.hbm %s435_s1, 1024 }
   0x2   :  { %s18_s16 = sshll.u32 %s357_s15, 4  ;;  %p310_p0 = scmp.ne.s32.totalorder %s435_s1, %s309_s19  ;;  %s19_s16 = int_to_ptr.vmem [resolvable:$true] %s18_s16 }
   0x3   :  { %p313_p1 = scmp.lt.u32.totalorder %s309_s19, %s435_s1 }
   0x5   :  { %p315_p2 = pnand %p313_p1, %p310_p0 }
   0x7   :  { %318 = shalt.err (!%p315_p2)
}
   0x8   :  { %s319_s24 = scalar_lea.vmem %s19_s16, 1024  ;;  %p324_p4 = scmp.lt.s32.totalorder %s19_s16, %s19_s16 }
   0x9   :  { %p320_p3 = scmp.ne.s32.totalorder %s19_s16, %s319_s24  ;;  %p325_p5 = scmp.lt.s32.totalorder %s319_s24, %s319_s24 }
   0xb   :  { %p326_p6 = por %p325_p5, %p324_p4 }
   0xd   :  { %p327_p7 = pnand %p326_p6, %p320_p3 }
   0xf   :  { %330 = shalt.err (!%p327_p7)
}
  0x10   :  { %s358_s25 = smov 64   ;;  %s359_s26 = smov 4  }
  0x11   :  { %24 = dma.hbm_to_vmem [thread:$0]  %s435_s1, 1024, %s19_s16, [#allocation4], %s358_s25, %s358_s25, %s359_s26  }
  0x12   :  { %353 = dma.done.wait [#allocation4], 1024  }
  0x13   :  { %354 = vsyncadd [#allocation4], 4294966272  ;;  %v360_v0 = vmov 0   ;;  %v299_v1 = vld [vmem:[#allocation3] sm:$0xff]   ;;  %v300_v2 = vld [vmem:[#allocation3 + $0x8] sm:$0xff]   ;;  %s361_s15 = smov [#allocation6]  }
  0x14   :  { %298 = vset.pattern.permute.xlu1 %v360_v0  ;;  %297 = vset.pattern.permute.xlu0 %v360_v0  ;;  %v301_v3 = vld [vmem:[#allocation3 + $0x10] sm:$0xff]   ;;  %v302_v4 = vld [vmem:[#allocation3 + $0x18] sm:$0xff]   ;;  %v307_v5 = vld [vmem:[%s434_s0] sm:$0xff]   ;;  %s237_s16 = sshll.u32 %s361_s15, 4  ;;  %s238_s16 = int_to_ptr.vmem [resolvable:$true] %s237_s16 }
  0x15   :  { %270 = vmatprep.subr.bf16.mxu0 %v299_v1  ;;  %286 = vmatprep.mubr.bf16.mxu0 %v307_v5  ;;  %v191_v6 = vld [vmem:[%s437_s3 + $0x10] sm:$0xff]  ;;  %v189_v7 = vld [vmem:[%s437_s3] sm:$0xff]  ;;  %v192_v9 = vld [vmem:[%s437_s3 + $0x18] sm:$0xff]  ;;  %p336_p9 = scmp.lt.s32.totalorder %s238_s16, %s238_s16 }
  0x16   :  { %271 = vmatpush3.bf16.msra.mxu0 %v299_v1  ;;  %205 = vperm.xlu1 %298, %v191_v6   ;;  %v303_v8 = vld [vmem:[#allocation3 + $0x20] sm:$0xff]   ;;  %v190_v10 = vld [vmem:[%s437_s3 + $0x8] sm:$0xff]  ;;  %v305_v12 = vld [vmem:[#allocation3 + $0x30] sm:$0xff]  }
  0x17   :  { %272 = vmatprep.subr.bf16.mxu0 %v300_v2  ;;  %195 = vperm.xlu0 %297, %v189_v7   ;;  %v304_v11 = vld [vmem:[#allocation3 + $0x28] sm:$0xff]   ;;  %v306_v13 = vld [vmem:[#allocation3 + $0x38] sm:$0xff]   ;;  %v259_v18 = vld [vmem:[%s436_s2] ss:$0 sm:$0xff] }
  0x18   :  { %v308_v14 = vld [vmem:[%s434_s0 + $0x8] sm:$0xff]   ;;  %s331_s0 = scalar_lea.vmem %s238_s16, 512 }
  0x19   :  { %p332_p8 = scmp.ne.s32.totalorder %s238_s16, %s331_s0  ;;  %p337_p10 = scmp.lt.s32.totalorder %s331_s0, %s331_s0 }
  0x1a   :  { %273 = vmatpush3.bf16.msra.mxu0 %v300_v2  ;;  %210 = vperm.xlu1 %298, %v192_v9  }
  0x1b   :  { %274 = vmatprep.subr.bf16.mxu0 %v301_v3  ;;  %200 = vperm.xlu0 %297, %v190_v10   ;;  %p338_p11 = por %p337_p10, %p336_p9 }
  0x1d   :  { %p339_p12 = pnand %p338_p11, %p332_p8 }
  0x1e   :  { %275 = vmatpush3.bf16.msra.mxu0 %v301_v3 }
  0x1f   :  { %276 = vmatprep.subr.bf16.mxu0 %v302_v4 }
  0x22   :  { %277 = vmatpush3.bf16.msra.mxu0 %v302_v4 }
  0x23   :  { %278 = vmatprep.subr.bf16.mxu0 %v303_v8 }
  0x26   :  { %279 = vmatpush3.bf16.msra.mxu0 %v303_v8 }
  0x27   :  { %280 = vmatprep.subr.bf16.mxu0 %v304_v11 }
  0x2a   :  { %281 = vmatpush3.bf16.msra.mxu0 %v304_v11 }
  0x2b   :  { %282 = vmatprep.subr.bf16.mxu0 %v305_v12 }
  0x2e   :  { %283 = vmatpush3.bf16.msra.mxu0 %v305_v12 }
  0x2f   :  { %284 = vmatprep.subr.bf16.mxu0 %v306_v13 }
  0x32   :  { %285 = vmatpush3.bf16.msra.mxu0 %v306_v13 }
  0x35   :  { %287 = vmatmul.mubr.bf16.vlgmr.msra.gmra.mrb[0].mxu0 %v308_v14 }
  0x95   :  { %v206_v15 = vpop.permute.xlu1 %205 }
  0x96   :  { %v196_v16 = vpop.permute.xlu0 %195 }
  0x99   :  { %v211_v21 = vpop.permute.xlu1 %210 }
  0x9a   :  { %v201_v24 = vpop.permute.xlu0 %200 }
 0x108   :  { %v288_v17 = vpop.f32.mrb[0].mxu0 }
 0x109   :  { %v215_v19 = vmul.f32 %v288_v17, %v206_v15  ;;  %v159_v20 = vpop.f32.mrb[1].mxu0 }
 0x10a   :  { %v213_v22 = vmul.f32 %v196_v16, %v159_v20  ;;  %v289_v23 = vpop.f32.mrb[2].mxu0 }
 0x10b   :  { %v226_v25 = vadd.f32 %v259_v18, %v215_v19  ;;  %v216_v26 = vmul.f32 %v289_v23, %v211_v21  ;;  %v162_v27 = vpop.f32.mrb[3].mxu0 }
 0x10c   :  { %v224_v28 = vadd.f32 %v259_v18, %v213_v22  ;;  %v214_v29 = vmul.f32 %v201_v24, %v162_v27 }
 0x10d   :  { %230 = vst [vmem:[#allocation6 + $0x10] sm:$0xff] %v226_v25  ;;  %v227_v30 = vadd.f32 %v259_v18, %v216_v26 }
 0x10e   :  { %228 = vst [vmem:[#allocation6] sm:$0xff] %v224_v28  ;;  %v225_v31 = vadd.f32 %v259_v18, %v214_v29 }
 0x10f   :  { %231 = vst [vmem:[#allocation6 + $0x18] sm:$0xff] %v227_v30 }
 0x110   :  { %229 = vst [vmem:[#allocation6 + $0x8] sm:$0xff] %v225_v31 }
 0x111   :  { %342 = shalt.err (!%p339_p12)
}
 0x112   :  { %s343_s18 = scalar_lea.hbm %s438_s4, 512 }
 0x113   :  { %p344_p13 = scmp.ne.s32.totalorder %s438_s4, %s343_s18  ;;  %p347_p0 = scmp.lt.u32.totalorder %s343_s18, %s438_s4 }
 0x115   :  { %p349_p1 = pnand %p347_p0, %p344_p13 }
 0x117   :  { %352 = shalt.err (!%p349_p1)
}
 0x118   :  { %s362_s23 = smov 128   ;;  %s363_s24 = smov 8  }
 0x119   :  { %243 = dma.vmem_to_hbm [thread:$0]  %s238_s16, 512, %s438_s4, [#allocation5], %s362_s23, %s362_s23, %s363_s24  }
 0x11a   :  { %355 = dma.done.wait [#allocation5], 512  }
 0x11b   :  { %356 = vsyncadd [#allocation5], 4294966784 }
 0x11c   :  { %247 = vsyncpa [#allocation4], 1 }
 0x11d   :  { %248 = vsyncpa [#allocation5], 1 }

</bundles_post_ra>
